<compile_context>
chip_gen: v7x
topology: tpu7x:2x2x1
jax: 0.10.0
libtpu: 0.0.40
codegen_flags: <defaults>
</compile_context>

<pallas_src>
import functools

import jax
import jax.numpy as jnp
from jax.experimental import pallas as pl
from jax.experimental.pallas import tpu as pltpu


def _round_up(x, m):
    return (x + m - 1) // m * m


def _proj_kernel(x_ref, w_ref, b_ref, o_ref, *, use_mxu):
    """One (batch, token-tile) grid step.

    x_ref: (C, TN)  channels on sublanes, tokens on the lane axis (native NCHW)
    w_ref: (E, C)   nn.Linear weight, untransposed, VMEM-resident across grid
    b_ref: (1, E)   bias row
    o_ref: (TN, E)  output tile already in the module's (tokens, embed) layout
    """
    x = x_ref[...]
    w = w_ref[...]
    b = b_ref[...]
    if use_mxu:
        # (TN, E) = x^T . w^T, contracting C on the MXU with f32 accumulation.
        acc = jax.lax.dot_general(
            x, w,
            dimension_numbers=(((0,), (1,)), ((), ())),
            preferred_element_type=jnp.float32,
        )
    else:
        # Tiny contraction dim: C broadcast-FMAs on the VPU build (E, TN) with
        # tokens kept dense on lanes, then ONE in-kernel XLU transpose flips
        # the register-resident accumulator to (TN, E).  This replaces the
        # previous wrapper-side HBM transpose of the whole output.
        c_dim = x.shape[0]
        acc_t = w[:, 0:1] * x[0:1, :]
        for c in range(1, c_dim):
            acc_t = acc_t + w[:, c:c + 1] * x[c:c + 1, :]
        acc = jnp.transpose(acc_t)
    o_ref[...] = (acc + b).astype(o_ref.dtype)


def _pick_token_tile(C, E, N, itemsize, budget_bytes):
    """Largest lane-dense token tile whose double-buffered footprint fits budget."""
    n_pad = _round_up(N, 128)
    resident = 2 * (E * C + E) * itemsize            # weight + bias buffers
    avail = max(budget_bytes - resident, 0)
    # double-buffered x tile + out tile, plus the f32 accumulator / transpose copy
    per_token = 2 * (C + E) * itemsize + 2 * E * 4
    tn = avail // max(per_token, 1)
    tn = (tn // 128) * 128
    tn = max(128, min(tn, 4096, n_pad))
    return tn


def mlp_forward(x, weight, bias, *, vmem_tile_budget_bytes=16 * 1024 * 1024):
    """x: (B, C, H, W). weight: (E, C). bias: (E,). Returns (B, H*W, E)."""
    B, C, H, W = x.shape
    E = weight.shape[0]
    N = H * W
    itemsize = jnp.dtype(x.dtype).itemsize

    # Layout glue only (no data movement): NCHW is already contiguous as (B, C, N).
    x_cn = x.reshape(B, C, N)
    b_row = bias.reshape(1, E)

    tn = _pick_token_tile(C, E, N, itemsize, vmem_tile_budget_bytes)
    grid = (B, pl.cdiv(N, tn))                       # ragged tail handled by masking
    use_mxu = C >= 128

    kernel = functools.partial(_proj_kernel, use_mxu=use_mxu)

    cost = pl.CostEstimate(
        flops=2 * B * N * C * E,
        transcendentals=0,
        bytes_accessed=itemsize * (B * C * N + E * C + E + B * E * N),
    )

    out = pl.pallas_call(
        kernel,
        out_shape=jax.ShapeDtypeStruct((B, N, E), x.dtype),
        grid_spec=pltpu.PrefetchScalarGridSpec(
            num_scalar_prefetch=0,
            grid=grid,
            in_specs=[
                # Native (B, C, N): batch squeezed, tokens on the lane axis.
                pl.BlockSpec((None, C, tn), lambda b, n: (b, 0, n)),
                # Full weight / bias, resident across the whole grid.
                pl.BlockSpec((E, C), lambda b, n: (0, 0)),
                pl.BlockSpec((1, E), lambda b, n: (0, 0)),
            ],
            # Output written directly in (B, N, E) — no wrapper transpose pass.
            out_specs=pl.BlockSpec((None, tn, E), lambda b, n: (b, n, 0)),
        ),
        compiler_params=pltpu.CompilerParams(
            dimension_semantics=("parallel", "parallel"),
            # Raise v5e's 16 MiB scoped default; stay well under v7x's 64 MiB.
            vmem_limit_bytes=32 * 1024 * 1024,
        ),
        cost_estimate=cost,
    )(x_cn, weight, b_row)

    return out


def init_params(key, dim, embed_dim):
    # Deterministic init mimicking nn.Linear default (uniform +/- 1/sqrt(dim)).
    k_w, k_b = jax.random.split(key)
    bound = 1.0 / jnp.sqrt(jnp.asarray(dim, jnp.float32))
    weight = jax.random.uniform(k_w, (embed_dim, dim), jnp.float32, -bound, bound)
    bias = jax.random.uniform(k_b, (embed_dim,), jnp.float32, -bound, bound)
    return weight, bias


if __name__ == "__main__":
    key = jax.random.PRNGKey(0)
    k_x, k_p = jax.random.split(key)

    B, C, H, W = 2, 4, 16, 16     # dim = C = 4
    embed_dim = 32

    x = jax.random.normal(k_x, (B, C, H, W), jnp.float32)
    weight, bias = init_params(k_p, C, embed_dim)

    y = jax.block_until_ready(mlp_forward(x, weight, bias))

    # reference check (pure JAX)
    x_tok = jnp.transpose(x.reshape(B, C, H * W), (0, 2, 1))
    y_ref = x_tok @ weight.T + bias
    assert y.shape == (B, H * W, embed_dim)
    assert jnp.allclose(y, y_ref, atol=1e-5, rtol=1e-5)

    print("KERNEL_OK")
</pallas_src>

<mosaic_0001>
module attributes {stable_mosaic.version = 11 : i64} {
  func.func @_proj_kernel(%arg0: i32, %arg1: i32, %arg2: memref<1x4x256xf32, #tpu.memory_space<vmem>>, %arg3: memref<32x4xf32, #tpu.memory_space<vmem>>, %arg4: memref<1x32xf32, #tpu.memory_space<vmem>>, %arg5: memref<1x256x32xf32, #tpu.memory_space<vmem>>) attributes {dimension_semantics = [#tpu.dimension_semantics<parallel>, #tpu.dimension_semantics<parallel>], iteration_bounds = array<i64: 2, 1>, scalar_prefetch = 0 : i64, scratch_operands = 0 : i64, tpu.core_type = #tpu.core_type<tc>, window_params = [{transform_indices = @transform_0, window_bounds = array<i64: 1, 4, 256>}, {pipeline_mode = #tpu.pipeline_mode<synchronous>, transform_indices = @transform_1, window_bounds = array<i64: 32, 4>}, {pipeline_mode = #tpu.pipeline_mode<synchronous>, transform_indices = @transform_2, window_bounds = array<i64: 1, 32>}, {transform_indices = @transform_3, window_bounds = array<i64: 1, 256, 32>}]} {
    %c0 = arith.constant 0 : index
    %c0_0 = arith.constant 0 : index
    %c0_1 = arith.constant 0 : index
    %0 = vector.load %arg2[%c0, %c0_0, %c0_1] : memref<1x4x256xf32, #tpu.memory_space<vmem>>, vector<1x4x256xf32>
    %1 = vector.shape_cast %0 : vector<1x4x256xf32> to vector<4x256xf32>
    %c0_2 = arith.constant 0 : index
    %c0_3 = arith.constant 0 : index
    %2 = vector.load %arg3[%c0_2, %c0_3] : memref<32x4xf32, #tpu.memory_space<vmem>>, vector<32x4xf32>
    %c0_4 = arith.constant 0 : index
    %c0_5 = arith.constant 0 : index
    %3 = vector.load %arg4[%c0_4, %c0_5] : memref<1x32xf32, #tpu.memory_space<vmem>>, vector<1x32xf32>
    %4 = vector.extract_strided_slice %2 {offsets = [0, 0], sizes = [32, 1], strides = [1, 1]} : vector<32x4xf32> to vector<32x1xf32>
    %5 = vector.extract_strided_slice %1 {offsets = [0, 0], sizes = [1, 256], strides = [1, 1]} : vector<4x256xf32> to vector<1x256xf32>
    %6 = vector.broadcast %4 : vector<32x1xf32> to vector<32x256xf32>
    %7 = vector.broadcast %5 : vector<1x256xf32> to vector<32x256xf32>
    %8 = arith.mulf %6, %7 : vector<32x256xf32>
    %9 = vector.extract_strided_slice %2 {offsets = [0, 1], sizes = [32, 1], strides = [1, 1]} : vector<32x4xf32> to vector<32x1xf32>
    %10 = vector.extract_strided_slice %1 {offsets = [1, 0], sizes = [1, 256], strides = [1, 1]} : vector<4x256xf32> to vector<1x256xf32>
    %11 = vector.broadcast %9 : vector<32x1xf32> to vector<32x256xf32>
    %12 = vector.broadcast %10 : vector<1x256xf32> to vector<32x256xf32>
    %13 = arith.mulf %11, %12 : vector<32x256xf32>
    %14 = arith.addf %8, %13 : vector<32x256xf32>
    %15 = vector.extract_strided_slice %2 {offsets = [0, 2], sizes = [32, 1], strides = [1, 1]} : vector<32x4xf32> to vector<32x1xf32>
    %16 = vector.extract_strided_slice %1 {offsets = [2, 0], sizes = [1, 256], strides = [1, 1]} : vector<4x256xf32> to vector<1x256xf32>
    %17 = vector.broadcast %15 : vector<32x1xf32> to vector<32x256xf32>
    %18 = vector.broadcast %16 : vector<1x256xf32> to vector<32x256xf32>
    %19 = arith.mulf %17, %18 : vector<32x256xf32>
    %20 = arith.addf %14, %19 : vector<32x256xf32>
    %21 = vector.extract_strided_slice %2 {offsets = [0, 3], sizes = [32, 1], strides = [1, 1]} : vector<32x4xf32> to vector<32x1xf32>
    %22 = vector.extract_strided_slice %1 {offsets = [3, 0], sizes = [1, 256], strides = [1, 1]} : vector<4x256xf32> to vector<1x256xf32>
    %23 = vector.broadcast %21 : vector<32x1xf32> to vector<32x256xf32>
    %24 = vector.broadcast %22 : vector<1x256xf32> to vector<32x256xf32>
    %25 = arith.mulf %23, %24 : vector<32x256xf32>
    %26 = arith.addf %20, %25 : vector<32x256xf32>
    %27 = tpu.transpose %26, [1, 0] : vector<32x256xf32> -> vector<256x32xf32>
    %28 = vector.broadcast %3 : vector<1x32xf32> to vector<256x32xf32>
    %29 = arith.addf %27, %28 : vector<256x32xf32>
    %c0_6 = arith.constant 0 : index
    %c0_7 = arith.constant 0 : index
    %c0_8 = arith.constant 0 : index
    %30 = vector.load %arg5[%c0_6, %c0_7, %c0_8] : memref<1x256x32xf32, #tpu.memory_space<vmem>>, vector<1x256x32xf32>
    %31 = vector.shape_cast %30 : vector<1x256x32xf32> to vector<256x32xf32>
    %32 = vector.shape_cast %29 : vector<256x32xf32> to vector<1x256x32xf32>
    tpu.vector_store %arg5[%c0_6, %c0_7, %c0_8], %32 {strides = array<i32>} : memref<1x256x32xf32, #tpu.memory_space<vmem>>, vector<1x256x32xf32>,
    return
  }
  func.func @transform_0(%arg0: i32, %arg1: i32) -> (i32, i32, i32) {
    %c0_i32 = arith.constant 0 : i32
    %c0_i32_0 = arith.constant 0 : i32
    return %arg0, %c0_i32, %arg1 : i32, i32, i32
  }
  func.func @transform_1(%arg0: i32, %arg1: i32) -> (i32, i32) {
    %c0_i32 = arith.constant 0 : i32
    %c0_i32_0 = arith.constant 0 : i32
    %c0_i32_1 = arith.constant 0 : i32
    return %c0_i32, %c0_i32_0 : i32, i32
  }
  func.func @transform_2(%arg0: i32, %arg1: i32) -> (i32, i32) {
    %c0_i32 = arith.constant 0 : i32
    %c0_i32_0 = arith.constant 0 : i32
    %c0_i32_1 = arith.constant 0 : i32
    return %c0_i32, %c0_i32_0 : i32, i32
  }
  func.func @transform_3(%arg0: i32, %arg1: i32) -> (i32, i32, i32) {
    %c0_i32 = arith.constant 0 : i32
    %c0_i32_0 = arith.constant 0 : i32
    return %arg0, %arg1, %c0_i32 : i32, i32, i32
  }
}

</mosaic_0001>

<bundles_post_ra>
// kernel: tpu_custom_call.1
= control target key start
LH: loop header
LB: loop body
LE: loop exit
PB: predicated region body
PF: predicated region fallthrough
CT: control target
= control target key end

     0   :  { %s740_s12 = smov 0   ;;  %s742_s13 = smov 0   ;;  %s932_s0 = inlined_call_operand.vmem [shape: f32[2,4,256], index: 0, kind: input, shape index: {}]   ;;  %s933_s1 = inlined_call_operand.vmem [shape: f32[32,4], index: 1, kind: input, shape index: {}]   ;;  %s934_s2 = inlined_call_operand.vmem [shape: f32[1,32], index: 2, kind: input, shape index: {}]   ;;  %s935_s3 = inlined_call_operand.vmem [shape: f32[2,256,32], index: 3, kind: output, shape index: {}]  }
   0x1   :  { %s744_s14 = smov 0  }
   0x2 LB: > { %s25_s15 = sadd.s32 1, %s710_s13  ;;  %p639_p0 = scmp.ge.s32.totalorder %s714_s14, 1  ;;  %s714_s14 = sphi %s744_s14, %s13_s14   ;;  %s710_s13 = sphi %s742_s13, %s937_s13   ;;  %s706_s12 = sphi %s740_s12, %s936_s12  }
   0x3   : > { %p27_p1 = scmp.ge.s32.totalorder %s25_s15, 2  ;;  %p158_p2 = scmp.lt.s32.totalorder %s714_s14, 3 }
   0x5   : > { %s939_s15 = smov (%p27_p1, %s25_s15), 0  ;;  %p159_p3 = pnand %p639_p0, %p158_p2 }
   0x6   : > { %v212_v0 = vld [vmem:[%s933_s1 + $0x8] sm:$0xff] (!%p159_p3)  ;;  %v211_v1 = vld [vmem:[%s933_s1] sm:$0xff] (!%p159_p3)  ;;  %v716_v2 = vmov (!%p159_p3), 1   ;;  %v717_v3 = vmov (!%p159_p3), 0   ;;  %v213_v4 = vld [vmem:[%s933_s1 + $0x10] sm:$0xff] (!%p159_p3)  ;;  %v718_v5 = vmov (!%p159_p3), 2   ;;  %v237_v8 = vlaneseq (!%p159_p3) }
   0x7   : > { %162 = sbr.rel (%p159_p3) target bundleno = 365 (0x16d), region = 32  ;;  %678 = vset.pattern.permute.xlu0 (!%p159_p3), %v716_v2  ;;  %680 = vset.pattern.permute.xlu1 (!%p159_p3), %v717_v3  ;;  %v719_v6 = vmov (!%p159_p3), 3   ;;  %v214_v7 = vld [vmem:[%s933_s1 + $0x18] sm:$0xff] (!%p159_p3)  ;;  %p191_p4 = scmp.lt.s32.totalorder (!%p159_p3), %s706_s12, 1  ;;  %vm515_vm0 = vcmask (!%p159_p3), 261120  }
   0x8   : > { %223 = vperm.xlu1 (!%p159_p3), %680, %v212_v0   ;;  %264 = vperm.xlu0 (!%p159_p3), %678, %v211_v1   ;;  %v238_v9 = vshrl.u32 (!%p159_p3), %v237_v8, 7 }
   0xa   : > { %v239_v12 = vsub.s32 (!%p159_p3), 0, %v238_v9  ;;  %v243_v13 = vsub.s32 (!%p159_p3), 4, %v238_v9  ;;  %v281_v14 = vsub.s32 (!%p159_p3), 1, %v238_v9  ;;  %v285_v15 = vsub.s32 (!%p159_p3), 5, %v238_v9 }
   0xb   : > { %v331_v17 = vsub.s32 (!%p159_p3), 2, %v238_v9  ;;  %v335_v18 = vsub.s32 (!%p159_p3), 6, %v238_v9  ;;  %v381_v27 = vsub.s32 (!%p159_p3), 3, %v238_v9  ;;  %v385_v28 = vsub.s32 (!%p159_p3), 7, %v238_v9 }
   0xc   : > { %681 = vset.pattern.permute.xlu1 (!%p159_p3), %v716_v2  ;;  %679 = vset.pattern.permute.xlu0 (!%p159_p3), %v717_v3 }
   0xd   : > { %268 = vperm.xlu1 (!%p159_p3), %681, %v212_v0   ;;  %218 = vperm.xlu0 (!%p159_p3), %679, %v211_v1  }
   0xe   : > { %s941_s12 = smov (!%p191_p4, %s706_s12), 1 }
   0xf   : > { %s647_s24 = sshll.u32 %s941_s12, 3  ;;  %s648_s28 = sshll.u32 %s941_s12, 8 }
  0x10   : > { %s198_s27 = scalar_lea.vmem %s932_s0, %s647_s24  ;;  %s825_s6 = scalar_lea.vmem %s935_s3, %s648_s28 }
  0x11   : > { %682 = vset.pattern.permute.xlu1 %v718_v5  ;;  %228 = vperm.xlu0 %679, %v213_v4   ;;  %v210_v16 = vld [vmem:[%s198_s27] sm:$0xff] }
  0x12   : > { %314 = vperm.xlu1 %682, %v211_v1   ;;  %v240_v21 = vrot.slane %v210_v16, %v239_v12  ;;  %v244_v22 = vrot.slane %v210_v16, %v243_v13  ;;  %v282_v23 = vrot.slane %v210_v16, %v281_v14  ;;  %v286_v24 = vrot.slane %v210_v16, %v285_v15 }
  0x13   : > { %v332_v25 = vrot.slane %v210_v16, %v331_v17  ;;  %v336_v26 = vrot.slane %v210_v16, %v335_v18  ;;  %v382_v37 = vrot.slane %v210_v16, %v381_v27  ;;  %v386_v38 = vrot.slane %v210_v16, %v385_v28 }
  0x14   : > { %v780_v30 = vrot.slane %v240_v21, %v239_v12  ;;  %v782_v31 = vrot.slane %v244_v22, %v239_v12  ;;  %v292_v32 = vrot.slane %v282_v23, %v281_v14  ;;  %v296_v33 = vrot.slane %v286_v24, %v281_v14 }
  0x15   : > { %687 = vset.pattern.permute.xlu0 %v718_v5  ;;  %v784_v35 = vrot.slane %v332_v25, %v331_v17  ;;  %v786_v36 = vrot.slane %v336_v26, %v331_v17  ;;  %v790_v45 = vrot.slane %v382_v37, %v381_v27  ;;  %v792_v46 = vrot.slane %v386_v38, %v381_v27 }
  0x16   : > { %683 = vset.pattern.permute.xlu1 %v716_v2  ;;  %322 = vperm.xlu0 %687, %v213_v4  }
  0x17   : > { %272 = vperm.xlu1 %683, %v213_v4  }
  0x1a   : > { %688 = vset.pattern.permute.xlu0 %v719_v6 }
  0x1b   : > { %684 = vset.pattern.permute.xlu1 %v718_v5  ;;  %364 = vperm.xlu0 %688, %v211_v1  }
  0x1c   : > { %318 = vperm.xlu1 %684, %v212_v0  }
  0x1f   : > { %372 = vperm.xlu0 %688, %v213_v4  }
  0x20   : > { %685 = vset.pattern.permute.xlu1 %v717_v3 }
  0x21   : > { %233 = vperm.xlu1 %685, %v214_v7  }
  0x25   : > { %686 = vset.pattern.permute.xlu1 %v716_v2 }
  0x26   : > { %276 = vperm.xlu1 %686, %v214_v7  }
  0x2a   : > { %689 = vset.pattern.permute.xlu1 %v719_v6 }
  0x2b   : > { %368 = vperm.xlu1 %689, %v212_v0  }
  0x2f   : > { %690 = vset.pattern.permute.xlu1 %v718_v5 }
  0x30   : > { %326 = vperm.xlu1 %690, %v214_v7  }
  0x34   : > { %691 = vset.pattern.permute.xlu1 %v719_v6 }
  0x35   : > { %376 = vperm.xlu1 %691, %v214_v7  }
  0x87   : > { %v224_v10 = vpop.permute.xlu1 %223  ;;  %v265_v11 = vpop.permute.xlu0 %264 }
  0x88   : > { %v297_v39 = vmul.f32 %v292_v32, %v265_v11  ;;  %v298_v40 = vmul.f32 %v296_v33, %v265_v11  ;;  %v257_v3 = vmul.f32 %v780_v30, %v224_v10  ;;  %v258_v4 = vmul.f32 %v782_v31, %v224_v10 }
  0x8c   : > { %v269_v19 = vpop.permute.xlu1 %268  ;;  %v219_v20 = vpop.permute.xlu0 %218 }
  0x8d   : > { %v255_v41 = vmul.f32 %v780_v30, %v219_v20  ;;  %v256_v42 = vmul.f32 %v782_v31, %v219_v20  ;;  %v299_v60 = vmul.f32 %v292_v32, %v269_v19  ;;  %v300_v61 = vmul.f32 %v296_v33, %v269_v19 }
  0x8f   : > { %v305_v47 = vadd.f32 %v297_v39, %v255_v41  ;;  %v306_v48 = vadd.f32 %v298_v40, %v256_v42  ;;  %v307_v7 = vadd.f32 %v299_v60, %v257_v3  ;;  %v308_v8 = vadd.f32 %v300_v61, %v258_v4 }
  0x90   : > { %v229_v29 = vpop.permute.xlu0 %228 }
  0x91   : > { %v315_v34 = vpop.permute.xlu1 %314  ;;  %v259_v63 = vmul.f32 %v780_v30, %v229_v29  ;;  %v260_v0 = vmul.f32 %v782_v31, %v229_v29 }
  0x92   : > { %v347_v49 = vmul.f32 %v784_v35, %v315_v34  ;;  %v348_v50 = vmul.f32 %v786_v36, %v315_v34 }
  0x94   : > { %v355_v52 = vadd.f32 %v347_v49, %v305_v47  ;;  %v356_v53 = vadd.f32 %v348_v50, %v306_v48 }
  0x95   : > { %v323_v43 = vpop.permute.xlu0 %322 }
  0x96   : > { %v273_v44 = vpop.permute.xlu1 %272  ;;  %v351_v13 = vmul.f32 %v784_v35, %v323_v43  ;;  %v352_v14 = vmul.f32 %v786_v36, %v323_v43 }
  0x97   : > { %v301_v1 = vmul.f32 %v292_v32, %v273_v44  ;;  %v302_v2 = vmul.f32 %v296_v33, %v273_v44 }
  0x99   : > { %v309_v11 = vadd.f32 %v301_v1, %v259_v63  ;;  %v310_v12 = vadd.f32 %v302_v2, %v260_v0 }
  0x9a   : > { %v365_v51 = vpop.permute.xlu0 %364 }
  0x9b   : > { %v397_v54 = vmul.f32 %v790_v45, %v365_v51  ;;  %v398_v55 = vmul.f32 %v792_v46, %v365_v51  ;;  %v319_v56 = vpop.permute.xlu1 %318  ;;  %v359_v23 = vadd.f32 %v351_v13, %v309_v11  ;;  %v360_v24 = vadd.f32 %v352_v14, %v310_v12 }
  0x9c   : > { %v349_v5 = vmul.f32 %v784_v35, %v319_v56  ;;  %v350_v6 = vmul.f32 %v786_v36, %v319_v56 }
  0x9d   : > { %v405_v57 = vadd.f32 %v397_v54, %v355_v52  ;;  %v406_v58 = vadd.f32 %v398_v55, %v356_v53 }
  0x9e   : > { %v373_v9 = vpop.permute.xlu0 %372  ;;  %v357_v16 = vadd.f32 %v349_v5, %v307_v7  ;;  %v358_v17 = vadd.f32 %v350_v6, %v308_v8 }
  0x9f   : > { %445 = vxpose.xlu0.b32.start [1/4] (short) %v406_v58, 128  ;;  %413 = vxpose.xlu1.b32.start [1/4] (short) %v405_v57, 128  ;;  %v401_v19 = vmul.f32 %v790_v45, %v373_v9  ;;  %v402_v20 = vmul.f32 %v792_v46, %v373_v9 }
  0xa0   : > { %v234_v59 = vpop.permute.xlu1 %233 }
  0xa1   : > { %v409_v28 = vadd.f32 %v401_v19, %v359_v23  ;;  %v410_v29 = vadd.f32 %v402_v20, %v360_v24  ;;  %v261_v34 = vmul.f32 %v780_v30, %v234_v59  ;;  %v262_v37 = vmul.f32 %v782_v31, %v234_v59  ;;  %v820_v31 = vld [vmem:[%s934_s2] ss:$0 sm:$0xff] }
  0xa5   : > { %v277_v62 = vpop.permute.xlu1 %276 }
  0xa6   : > { %v303_v25 = vmul.f32 %v292_v32, %v277_v62  ;;  %v304_v26 = vmul.f32 %v296_v33, %v277_v62 }
  0xa8   : > { %v311_v40 = vadd.f32 %v303_v25, %v261_v34  ;;  %v312_v41 = vadd.f32 %v304_v26, %v262_v37 }
  0xaa   : > { %v369_v15 = vpop.permute.xlu1 %368 }
  0xab   : > { %v399_v18 = vmul.f32 %v790_v45, %v369_v15  ;;  %v400_v10 = vmul.f32 %v792_v46, %v369_v15 }
  0xad   : > { %v407_v21 = vadd.f32 %v399_v18, %v357_v16  ;;  %v408_v22 = vadd.f32 %v400_v10, %v358_v17 }
  0xaf   : > { %v327_v27 = vpop.permute.xlu1 %326  ;;  %446 = vxpose.xlu0.b32.cont [2/4] (short) %v408_v22, 128  ;;  %414 = vxpose.xlu1.b32.cont [2/4] (short) %v407_v21, 128 }
  0xb0   : > { %v353_v38 = vmul.f32 %v784_v35, %v327_v27  ;;  %v354_v39 = vmul.f32 %v786_v36, %v327_v27 }
  0xb2   : > { %v361_v33 = vadd.f32 %v353_v38, %v311_v40  ;;  %v362_v42 = vadd.f32 %v354_v39, %v312_v41 }
  0xb3   : > { %447 = vxpose.xlu0.b32.cont [3/4] (short) %v410_v29, 128  ;;  %415 = vxpose.xlu1.b32.cont [3/4] (short) %v409_v28, 128 }
  0xb4   : > { %v377_v32 = vpop.permute.xlu1 %376 }
  0xb5   : > { %v403_v43 = vmul.f32 %v790_v45, %v377_v32  ;;  %v404_v44 = vmul.f32 %v792_v46, %v377_v32 }
  0xb7   : > { %v411_v47 = vadd.f32 %v403_v43, %v361_v33  ;;  %v412_v30 = vadd.f32 %v404_v44, %v362_v42 }
  0xb9   : > { %448 = vxpose.xlu0.b32.end [4/4] (short) %v412_v30, 128  ;;  %416 = vxpose.xlu1.b32.end [4/4] (short) %v411_v47, 128 }
 0x12d   : > { %v461_v35 = vpop.trf.xlu0  ;;  %v429_v36 = vpop.trf.xlu1 }
 0x12e   : > { %v499_v45 = vadd.f32 %v820_v31, %v461_v35  ;;  %v483_v46 = vadd.f32 %v820_v31, %v429_v36 }
 0x130   : > { %532 = vst.msk [vmem:[%s825_s6 + $0x80] sm:$0xff] %vm515_vm0, %v499_v45  ;;  %516 = vst.msk [vmem:[%s825_s6] sm:$0xff] %vm515_vm0, %v483_v46 }
 0x131   : > { %v462_v48 = vpop.trf.xlu0  ;;  %v430_v49 = vpop.trf.xlu1 }
 0x132   : > { %v500_v50 = vadd.f32 %v820_v31, %v462_v48  ;;  %v484_v51 = vadd.f32 %v820_v31, %v430_v49 }
 0x134   : > { %533 = vst.msk [vmem:[%s825_s6 + $0x88] sm:$0xff] %vm515_vm0, %v500_v50  ;;  %517 = vst.msk [vmem:[%s825_s6 + $0x8] sm:$0xff] %vm515_vm0, %v484_v51 }
 0x135   : > { %v463_v52 = vpop.trf.xlu0  ;;  %v431_v53 = vpop.trf.xlu1 }
 0x136   : > { %v501_v54 = vadd.f32 %v820_v31, %v463_v52  ;;  %v485_v55 = vadd.f32 %v820_v31, %v431_v53 }
 0x138   : > { %534 = vst.msk [vmem:[%s825_s6 + $0x90] sm:$0xff] %vm515_vm0, %v501_v54  ;;  %518 = vst.msk [vmem:[%s825_s6 + $0x10] sm:$0xff] %vm515_vm0, %v485_v55 }
 0x139   : > { %v464_v56 = vpop.trf.xlu0  ;;  %v432_v57 = vpop.trf.xlu1 }
 0x13a   : > { %v502_v58 = vadd.f32 %v820_v31, %v464_v56  ;;  %v486_v59 = vadd.f32 %v820_v31, %v432_v57 }
 0x13c   : > { %535 = vst.msk [vmem:[%s825_s6 + $0x98] sm:$0xff] %vm515_vm0, %v502_v58  ;;  %519 = vst.msk [vmem:[%s825_s6 + $0x18] sm:$0xff] %vm515_vm0, %v486_v59 }
 0x13d   : > { %v465_v60 = vpop.trf.xlu0  ;;  %v433_v61 = vpop.trf.xlu1 }
 0x13e   : > { %v503_v62 = vadd.f32 %v820_v31, %v465_v60  ;;  %v487_v63 = vadd.f32 %v820_v31, %v433_v61 }
 0x140   : > { %536 = vst.msk [vmem:[%s825_s6 + $0xa0] sm:$0xff] %vm515_vm0, %v503_v62  ;;  %520 = vst.msk [vmem:[%s825_s6 + $0x20] sm:$0xff] %vm515_vm0, %v487_v63 }
 0x141   : > { %v466_v0 = vpop.trf.xlu0  ;;  %v434_v1 = vpop.trf.xlu1 }
 0x142   : > { %v504_v2 = vadd.f32 %v820_v31, %v466_v0  ;;  %v488_v3 = vadd.f32 %v820_v31, %v434_v1 }
 0x144   : > { %537 = vst.msk [vmem:[%s825_s6 + $0xa8] sm:$0xff] %vm515_vm0, %v504_v2  ;;  %521 = vst.msk [vmem:[%s825_s6 + $0x28] sm:$0xff] %vm515_vm0, %v488_v3 }
 0x145   : > { %v467_v4 = vpop.trf.xlu0  ;;  %v435_v5 = vpop.trf.xlu1 }
 0x146   : > { %v505_v6 = vadd.f32 %v820_v31, %v467_v4  ;;  %v489_v7 = vadd.f32 %v820_v31, %v435_v5 }
 0x148   : > { %538 = vst.msk [vmem:[%s825_s6 + $0xb0] sm:$0xff] %vm515_vm0, %v505_v6  ;;  %522 = vst.msk [vmem:[%s825_s6 + $0x30] sm:$0xff] %vm515_vm0, %v489_v7 }
 0x149   : > { %v468_v8 = vpop.trf.xlu0  ;;  %v436_v9 = vpop.trf.xlu1 }
 0x14a   : > { %v506_v11 = vadd.f32 %v820_v31, %v468_v8  ;;  %v490_v12 = vadd.f32 %v820_v31, %v436_v9 }
 0x14c   : > { %539 = vst.msk [vmem:[%s825_s6 + $0xb8] sm:$0xff] %vm515_vm0, %v506_v11  ;;  %523 = vst.msk [vmem:[%s825_s6 + $0x38] sm:$0xff] %vm515_vm0, %v490_v12 }
 0x14d   : > { %v469_v13 = vpop.trf.xlu0  ;;  %v437_v14 = vpop.trf.xlu1 }
 0x14e   : > { %v507_v15 = vadd.f32 %v820_v31, %v469_v13  ;;  %v491_v16 = vadd.f32 %v820_v31, %v437_v14 }
 0x150   : > { %540 = vst.msk [vmem:[%s825_s6 + $0xc0] sm:$0xff] %vm515_vm0, %v507_v15  ;;  %524 = vst.msk [vmem:[%s825_s6 + $0x40] sm:$0xff] %vm515_vm0, %v491_v16 }
 0x151   : > { %v470_v17 = vpop.trf.xlu0  ;;  %v438_v18 = vpop.trf.xlu1 }
 0x152   : > { %v508_v10 = vadd.f32 %v820_v31, %v470_v17  ;;  %v492_v19 = vadd.f32 %v820_v31, %v438_v18 }
 0x154   : > { %541 = vst.msk [vmem:[%s825_s6 + $0xc8] sm:$0xff] %vm515_vm0, %v508_v10  ;;  %525 = vst.msk [vmem:[%s825_s6 + $0x48] sm:$0xff] %vm515_vm0, %v492_v19 }
 0x155   : > { %v471_v20 = vpop.trf.xlu0  ;;  %v439_v21 = vpop.trf.xlu1 }
 0x156   : > { %v509_v22 = vadd.f32 %v820_v31, %v471_v20  ;;  %v493_v23 = vadd.f32 %v820_v31, %v439_v21 }
 0x158   : > { %542 = vst.msk [vmem:[%s825_s6 + $0xd0] sm:$0xff] %vm515_vm0, %v509_v22  ;;  %526 = vst.msk [vmem:[%s825_s6 + $0x50] sm:$0xff] %vm515_vm0, %v493_v23 }
 0x159   : > { %v472_v24 = vpop.trf.xlu0  ;;  %v440_v25 = vpop.trf.xlu1 }
 0x15a   : > { %v510_v26 = vadd.f32 %v820_v31, %v472_v24  ;;  %v494_v27 = vadd.f32 %v820_v31, %v440_v25 }
 0x15c   : > { %543 = vst.msk [vmem:[%s825_s6 + $0xd8] sm:$0xff] %vm515_vm0, %v510_v26  ;;  %527 = vst.msk [vmem:[%s825_s6 + $0x58] sm:$0xff] %vm515_vm0, %v494_v27 }
 0x15d   : > { %v473_v28 = vpop.trf.xlu0  ;;  %v441_v29 = vpop.trf.xlu1 }
 0x15e   : > { %v511_v34 = vadd.f32 %v820_v31, %v473_v28  ;;  %v495_v37 = vadd.f32 %v820_v31, %v441_v29 }
 0x160   : > { %544 = vst.msk [vmem:[%s825_s6 + $0xe0] sm:$0xff] %vm515_vm0, %v511_v34  ;;  %528 = vst.msk [vmem:[%s825_s6 + $0x60] sm:$0xff] %vm515_vm0, %v495_v37 }
 0x161   : > { %v474_v38 = vpop.trf.xlu0  ;;  %v442_v39 = vpop.trf.xlu1 }
 0x162   : > { %v512_v40 = vadd.f32 %v820_v31, %v474_v38  ;;  %v496_v41 = vadd.f32 %v820_v31, %v442_v39 }
 0x164   : > { %545 = vst.msk [vmem:[%s825_s6 + $0xe8] sm:$0xff] %vm515_vm0, %v512_v40  ;;  %529 = vst.msk [vmem:[%s825_s6 + $0x68] sm:$0xff] %vm515_vm0, %v496_v41 }
 0x165   : > { %v475_v32 = vpop.trf.xlu0  ;;  %v443_v33 = vpop.trf.xlu1 }
 0x166   : > { %v513_v42 = vadd.f32 %v820_v31, %v475_v32  ;;  %v497_v43 = vadd.f32 %v820_v31, %v443_v33 }
 0x168   : > { %546 = vst.msk [vmem:[%s825_s6 + $0xf0] sm:$0xff] %vm515_vm0, %v513_v42  ;;  %530 = vst.msk [vmem:[%s825_s6 + $0x70] sm:$0xff] %vm515_vm0, %v497_v43 }
 0x169   : > { %v476_v44 = vpop.trf.xlu0  ;;  %v444_v47 = vpop.trf.xlu1 }
 0x16a   : > { %v514_v30 = vadd.f32 %v820_v31, %v476_v44  ;;  %v498_v35 = vadd.f32 %v820_v31, %v444_v47 }
 0x16c   : > { %547 = vst.msk [vmem:[%s825_s6 + $0xf8] sm:$0xff] %vm515_vm0, %v514_v30  ;;  %531 = vst.msk [vmem:[%s825_s6 + $0x78] sm:$0xff] %vm515_vm0, %v498_v35 }
 0x16d PF: > { %s13_s14 = sadd.s32 1, %s714_s14   ;;  %s936_s12 = smov %s710_s13 }
 0x16e   : > { %p10_p5 = scmp.ge.s32.totalorder %s13_s14, 4   ;;  %s937_s13 = smov %s939_s15 }
 0x170   :  { %12 = sbr.rel (!%p10_p5) target bundleno = 2 (0x2), region = 62 }

</bundles_post_ra>
